<compile_context>
chip_gen: v7x
topology: tpu7x:2x2x1
jax: 0.10.0
libtpu: 0.0.40
codegen_flags: <defaults>
</compile_context>

<pallas_src>
import functools

import jax
import jax.numpy as jnp
from jax.experimental import pallas as pl
from jax.experimental.pallas import tpu as pltpu


def _round_up(x, m):
    return (x + m - 1) // m * m


def _pick_tile(dim, candidates):
    """Largest candidate tile that evenly divides `dim` (dim is a multiple of 8)."""
    for t in candidates:
        if dim >= t and dim % t == 0:
            return t
    return dim


@functools.lru_cache(maxsize=None)
def _vmem_limit_bytes():
    """~55% of this generation's physical VMEM (64 MiB v7x / 128 MiB v5e-v6e)."""
    cap = 64 * 1024 * 1024
    try:
        info = pltpu.get_tpu_info()
        cap = int(getattr(info, "vmem_capacity_bytes", cap) or cap)
    except Exception:
        pass
    return int(cap * 0.55)


# ---------------------------------------------------------------------------
# QKV projection: q, k, v = x @ Wq, x @ Wk, x @ Wv   (weights fully resident)
# ---------------------------------------------------------------------------
def _qkv_kernel(x_ref, wq_ref, wk_ref, wv_ref, q_ref, k_ref, v_ref):
    x = x_ref[...]
    q_ref[...] = jnp.dot(x, wq_ref[...],
                         preferred_element_type=jnp.float32).astype(q_ref.dtype)
    k_ref[...] = jnp.dot(x, wk_ref[...],
                         preferred_element_type=jnp.float32).astype(k_ref.dtype)
    v_ref[...] = jnp.dot(x, wv_ref[...],
                         preferred_element_type=jnp.float32).astype(v_ref.dtype)


def pallas_qkv(x2d, wq, wk, wv, *, tm):
    """x2d: (M, Din); wq/wk/wv: (Din, Dout). Returns q, k, v each (M, Dout)."""
    M, Din = x2d.shape
    Dout = wq.shape[1]
    grid = (M // tm,)

    x_spec = pl.BlockSpec((tm, Din), lambda i: (i, 0))
    w_spec = pl.BlockSpec((Din, Dout), lambda i: (0, 0))      # resident weight
    o_spec = pl.BlockSpec((tm, Dout), lambda i: (i, 0))
    o_shape = jax.ShapeDtypeStruct((M, Dout), x2d.dtype)

    itemsize = jnp.dtype(x2d.dtype).itemsize
    cost = pl.CostEstimate(
        flops=3 * 2 * M * Din * Dout,
        transcendentals=0,
        bytes_accessed=(M * Din + 3 * Din * Dout + 3 * M * Dout) * itemsize,
    )

    return pl.pallas_call(
        _qkv_kernel,
        out_shape=(o_shape, o_shape, o_shape),
        grid_spec=pltpu.PrefetchScalarGridSpec(
            num_scalar_prefetch=0,
            grid=grid,
            in_specs=[x_spec, w_spec, w_spec, w_spec],
            out_specs=[o_spec, o_spec, o_spec],
        ),
        compiler_params=pltpu.CompilerParams(
            dimension_semantics=("parallel",),
            vmem_limit_bytes=_vmem_limit_bytes(),
        ),
        cost_estimate=cost,
    )(x2d, wq, wk, wv)


# ---------------------------------------------------------------------------
# Output projection: y = x @ W + b   (weight fully resident)
# ---------------------------------------------------------------------------
def _out_proj_kernel(x_ref, w_ref, b_ref, o_ref):
    acc = jnp.dot(x_ref[...], w_ref[...], preferred_element_type=jnp.float32)
    o_ref[...] = (acc + b_ref[...].astype(jnp.float32)).astype(o_ref.dtype)


def pallas_out_proj(x2d, w, b2d, *, tm):
    """x2d: (M, Din); w: (Din, Dout); b2d: (1, Dout)."""
    M, Din = x2d.shape
    Dout = w.shape[1]
    grid = (M // tm,)

    itemsize = jnp.dtype(x2d.dtype).itemsize
    cost = pl.CostEstimate(
        flops=2 * M * Din * Dout,
        transcendentals=0,
        bytes_accessed=(M * Din + Din * Dout + Dout + M * Dout) * itemsize,
    )

    return pl.pallas_call(
        _out_proj_kernel,
        out_shape=jax.ShapeDtypeStruct((M, Dout), x2d.dtype),
        grid_spec=pltpu.PrefetchScalarGridSpec(
            num_scalar_prefetch=0,
            grid=grid,
            in_specs=[
                pl.BlockSpec((tm, Din), lambda i: (i, 0)),
                pl.BlockSpec((Din, Dout), lambda i: (0, 0)),   # resident weight
                pl.BlockSpec((1, Dout), lambda i: (0, 0)),     # resident bias
            ],
            out_specs=pl.BlockSpec((tm, Dout), lambda i: (i, 0)),
        ),
        compiler_params=pltpu.CompilerParams(
            dimension_semantics=("parallel",),
            vmem_limit_bytes=_vmem_limit_bytes(),
        ),
        cost_estimate=cost,
    )(x2d, w, b2d)


# ---------------------------------------------------------------------------
# Flash attention on merged-head layout (B, N_pad, heads*dim_head).
# q already scaled (scale folded into Wq). Padded kv positions masked in-kernel.
# ---------------------------------------------------------------------------
def _flash_attn_kernel(q_ref, k_ref, v_ref, o_ref, m_ref, l_ref, acc_ref,
                       *, heads, dim_head, n_actual, tkv):
    ki = pl.program_id(2)

    @pl.when(ki == 0)
    def _():
        m_ref[...] = jnp.full(m_ref.shape, -1e30, jnp.float32)
        l_ref[...] = jnp.zeros_like(l_ref)
        acc_ref[...] = jnp.zeros_like(acc_ref)

    q = q_ref[0]   # (tq,  heads*dim_head) — merged heads, lane-dense load
    k = k_ref[0]   # (tkv, heads*dim_head)
    v = v_ref[0]   # (tkv, heads*dim_head)

    needs_mask = (n_actual % tkv) != 0          # static (trace-time) bool
    if needs_mask:
        kv_pos = ki * tkv + jax.lax.broadcasted_iota(jnp.int32, (1, tkv), 1)
        kv_valid = kv_pos < n_actual            # (1, tkv) -> broadcasts over rows

    # Statically unrolled per-head online softmax; state lives in VMEM scratch
    # indexed on the (cheap) leading axis.
    for h in range(heads):
        lo = h * dim_head
        hi = lo + dim_head
        qh = q[:, lo:hi]                        # (tq,  d)
        kh = k[:, lo:hi]                        # (tkv, d)
        vh = v[:, lo:hi]                        # (tkv, d)

        # QK^T without materializing a transpose: contract the last dims.
        s = jax.lax.dot_general(qh, kh, (((1,), (1,)), ((), ())),
                                preferred_element_type=jnp.float32)  # (tq, tkv)
        if needs_mask:
            s = jnp.where(kv_valid, s, jnp.float32(-1e30))

        m_prev = m_ref[h]                                           # (tq, 1)
        m_new = jnp.maximum(m_prev, jnp.max(s, axis=-1, keepdims=True))
        alpha = jnp.exp(m_prev - m_new)
        p = jnp.exp(s - m_new)                                      # unnormalized

        l_ref[h] = alpha * l_ref[h] + jnp.sum(p, axis=-1, keepdims=True)
        acc_ref[h] = alpha * acc_ref[h] + jnp.dot(
            p.astype(vh.dtype), vh, preferred_element_type=jnp.float32)
        m_ref[h] = m_new

    @pl.when(ki == pl.num_programs(2) - 1)
    def _():
        # Deferred normalization (exact divide, once per q tile) and merged
        # lane-dense output store.
        for h in range(heads):
            lo = h * dim_head
            o_ref[0, :, lo:lo + dim_head] = (
                acc_ref[h] / l_ref[h]).astype(o_ref.dtype)


def flash_attention(q, k, v, *, heads, dim_head, n_actual, tq, tkv):
    """q, k, v: (B, n_pad, heads*dim_head), q pre-scaled. Returns same shape."""
    B, n_pad, D = q.shape
    grid = (B, n_pad // tq, n_pad // tkv)

    kernel = functools.partial(_flash_attn_kernel, heads=heads,
                               dim_head=dim_head, n_actual=n_actual, tkv=tkv)

    itemsize = jnp.dtype(q.dtype).itemsize
    n_qtiles = n_pad // tq
    cost = pl.CostEstimate(
        flops=4 * B * n_pad * n_pad * D,                  # QK^T + PV
        transcendentals=B * heads * n_pad * n_pad,        # exp
        bytes_accessed=(2 * B * n_pad * D                 # q read + o write
                        + 2 * B * n_pad * D * n_qtiles    # k/v re-streamed
                        ) * itemsize,
    )

    return pl.pallas_call(
        kernel,
        out_shape=jax.ShapeDtypeStruct((B, n_pad, D), q.dtype),
        grid_spec=pltpu.PrefetchScalarGridSpec(
            num_scalar_prefetch=0,
            grid=grid,
            in_specs=[
                pl.BlockSpec((1, tq, D), lambda b, qi, ki: (b, qi, 0)),
                pl.BlockSpec((1, tkv, D), lambda b, qi, ki: (b, ki, 0)),
                pl.BlockSpec((1, tkv, D), lambda b, qi, ki: (b, ki, 0)),
            ],
            out_specs=pl.BlockSpec((1, tq, D), lambda b, qi, ki: (b, qi, 0)),
            scratch_shapes=[
                pltpu.VMEM((heads, tq, 1), jnp.float32),          # running max m
                pltpu.VMEM((heads, tq, 1), jnp.float32),          # running denom l
                pltpu.VMEM((heads, tq, dim_head), jnp.float32),   # accumulator
            ],
        ),
        compiler_params=pltpu.CompilerParams(
            dimension_semantics=("parallel", "parallel", "arbitrary"),
            vmem_limit_bytes=_vmem_limit_bytes(),
        ),
        cost_estimate=cost,
    )(q, k, v)


# ---------------------------------------------------------------------------
# Full SelfAttention forward
# ---------------------------------------------------------------------------
def self_attention(x, w_qkv, w_out, b_out, *, heads, dim_head):
    """x: (B, N, D); w_qkv: (3D, D) torch layout; w_out: (D, D) torch layout; b_out: (D,)."""
    B, N, D = x.shape
    assert D == heads * dim_head
    scale = dim_head ** (-0.5)
    dtype = x.dtype

    # Torch Linear layout (out, in): rows [0:D]->Wq, [D:2D]->Wk, [2D:3D]->Wv.
    # Transpose to (in, out) and fold the softmax scale into Wq (once, in f32).
    w_qkv = jnp.asarray(w_qkv, jnp.float32)
    wq_t = (w_qkv[0 * D:1 * D].T * scale).astype(dtype)   # (D, D)
    wk_t = w_qkv[1 * D:2 * D].T.astype(dtype)             # (D, D)
    wv_t = w_qkv[2 * D:3 * D].T.astype(dtype)             # (D, D)
    w_out_t = jnp.asarray(w_out).T.astype(dtype)          # (D, D)
    b_out2d = jnp.asarray(b_out).reshape(1, D).astype(dtype)

    # Pad the sequence to a tile multiple (zeros); padded kv is masked in-kernel.
    if N >= 128:
        n_pad = _round_up(N, 128)
        t_seq = _pick_tile(n_pad, (512, 256, 128))
    else:
        n_pad = _round_up(N, 8)
        t_seq = n_pad
    if n_pad != N:
        x = jnp.pad(x, ((0, 0), (0, n_pad - N), (0, 0)))

    M = B * n_pad
    tm = _pick_tile(M, (512, 256, 128, 64, 32, 16, 8))

    # QKV projection: merged-head q/k/v slabs, no splits / transposes.
    x2d = x.reshape(M, D)
    q2d, k2d, v2d = pallas_qkv(x2d, wq_t, wk_t, wv_t, tm=tm)
    q = q2d.reshape(B, n_pad, D)
    k = k2d.reshape(B, n_pad, D)
    v = v2d.reshape(B, n_pad, D)

    # Flash attention directly on the merged-head layout.
    attn = flash_attention(q, k, v, heads=heads, dim_head=dim_head,
                           n_actual=N, tq=t_seq, tkv=t_seq)   # (B, n_pad, D)

    # to_out: Linear(D, D) + bias; Dropout(p=0.0) is identity.
    out2d = pallas_out_proj(attn.reshape(M, D), w_out_t, b_out2d, tm=tm)
    out = out2d.reshape(B, n_pad, D)
    if n_pad != N:
        out = out[:, :N, :]
    return out


def self_attention_ref(x, w_qkv, w_out, b_out, *, heads, dim_head):
    """Pure-JAX f32 reference matching the PyTorch forward."""
    B, N, D = x.shape
    scale = dim_head ** (-0.5)
    qkv = jnp.einsum("bnd,od->bno", x, w_qkv)                  # (B, N, 3D)
    q, k, v = jnp.split(qkv, 3, axis=-1)

    def to_heads(t):
        return t.reshape(B, N, heads, dim_head).transpose(0, 2, 1, 3)

    q, k, v = map(to_heads, (q, k, v))
    dots = jnp.einsum("bhnd,bhmd->bhnm", q, k) * scale
    attn = jax.nn.softmax(dots, axis=-1)
    out = jnp.einsum("bhnm,bhmd->bhnd", attn, v)
    out = out.transpose(0, 2, 1, 3).reshape(B, N, D)
    out = jnp.einsum("bnd,od->bno", out, w_out) + b_out
    return out


if __name__ == "__main__":
    heads, dim_head = 2, 16
    D = heads * dim_head          # 32
    B, N = 2, 8

    key = jax.random.PRNGKey(0)
    k_x, k_wqkv, k_wout, k_bout, k_x2 = jax.random.split(key, 5)

    x = jax.random.normal(k_x, (B, N, D), dtype=jnp.float32)
    # PyTorch Linear weight layout: (out_features, in_features).
    bound = 1.0 / (D ** 0.5)
    w_qkv = jax.random.uniform(k_wqkv, (3 * D, D), jnp.float32, -bound, bound)
    w_out = jax.random.uniform(k_wout, (D, D), jnp.float32, -bound, bound)
    b_out = jax.random.uniform(k_bout, (D,), jnp.float32, -bound, bound)

    # f32 path.
    ref = self_attention_ref(x, w_qkv, w_out, b_out, heads=heads, dim_head=dim_head)
    out = self_attention(x, w_qkv, w_out, b_out, heads=heads, dim_head=dim_head)
    out = jax.block_until_ready(out)
    assert out.shape == (B, N, D)
    assert jnp.allclose(out, ref, atol=2e-3, rtol=2e-3), "f32 mismatch vs reference"

    # Ragged sequence length (exercises the padding + kv-mask path).
    N2 = 13
    x2 = jax.random.normal(k_x2, (B, N2, D), dtype=jnp.float32)
    ref2 = self_attention_ref(x2, w_qkv, w_out, b_out, heads=heads, dim_head=dim_head)
    out2 = jax.block_until_ready(
        self_attention(x2, w_qkv, w_out, b_out, heads=heads, dim_head=dim_head))
    assert out2.shape == (B, N2, D)
    assert jnp.allclose(out2, ref2, atol=2e-3, rtol=2e-3), "ragged-N mismatch vs reference"

    # bf16 operand path (MXU-native, f32 accumulation): loose tolerance.
    out_bf16 = jax.block_until_ready(
        self_attention(x.astype(jnp.bfloat16), w_qkv, w_out, b_out,
                       heads=heads, dim_head=dim_head))
    bf16_err = float(jnp.max(jnp.abs(out_bf16.astype(jnp.float32) - ref)))
    assert bf16_err < 1e-1, f"bf16 mismatch vs reference (max abs err {bf16_err})"

    print("KERNEL_OK")
</pallas_src>

<mosaic_0001>
module attributes {stable_mosaic.version = 11 : i64} {
  func.func @_qkv_kernel(%arg0: i32, %arg1: memref<16x32xf32, #tpu.memory_space<vmem>>, %arg2: memref<32x32xf32, #tpu.memory_space<vmem>>, %arg3: memref<32x32xf32, #tpu.memory_space<vmem>>, %arg4: memref<32x32xf32, #tpu.memory_space<vmem>>, %arg5: memref<16x32xf32, #tpu.memory_space<vmem>>, %arg6: memref<16x32xf32, #tpu.memory_space<vmem>>, %arg7: memref<16x32xf32, #tpu.memory_space<vmem>>) attributes {dimension_semantics = [#tpu.dimension_semantics<parallel>], iteration_bounds = array<i64: 1>, scalar_prefetch = 0 : i64, scratch_operands = 0 : i64, tpu.core_type = #tpu.core_type<tc>, window_params = [{transform_indices = @transform_0, window_bounds = array<i64: 16, 32>}, {pipeline_mode = #tpu.pipeline_mode<synchronous>, transform_indices = @transform_1, window_bounds = array<i64: 32, 32>}, {pipeline_mode = #tpu.pipeline_mode<synchronous>, transform_indices = @transform_2, window_bounds = array<i64: 32, 32>}, {pipeline_mode = #tpu.pipeline_mode<synchronous>, transform_indices = @transform_3, window_bounds = array<i64: 32, 32>}, {transform_indices = @transform_4, window_bounds = array<i64: 16, 32>}, {transform_indices = @transform_5, window_bounds = array<i64: 16, 32>}, {transform_indices = @transform_6, window_bounds = array<i64: 16, 32>}]} {
    %c0 = arith.constant 0 : index
    %c0_0 = arith.constant 0 : index
    %0 = vector.load %arg1[%c0, %c0_0] : memref<16x32xf32, #tpu.memory_space<vmem>>, vector<16x32xf32>
    %c0_1 = arith.constant 0 : index
    %c0_2 = arith.constant 0 : index
    %1 = vector.load %arg2[%c0_1, %c0_2] : memref<32x32xf32, #tpu.memory_space<vmem>>, vector<32x32xf32>
    %cst = arith.constant dense<0.000000e+00> : vector<16x32xf32>
    %2 = tpu.matmul %0, %1, %cst {dimension_numbers = #tpu.dot_dimension_numbers<[1], [0], [0], [1], [0, 0, 1, 1], [], []>} : vector<16x32xf32>, vector<32x32xf32>, vector<16x32xf32> -> vector<16x32xf32>
    %c0_3 = arith.constant 0 : index
    %c0_4 = arith.constant 0 : index
    %3 = vector.load %arg5[%c0_3, %c0_4] : memref<16x32xf32, #tpu.memory_space<vmem>>, vector<16x32xf32>
    tpu.vector_store %arg5[%c0_3, %c0_4], %2 {strides = array<i32>} : memref<16x32xf32, #tpu.memory_space<vmem>>, vector<16x32xf32>,
    %c0_5 = arith.constant 0 : index
    %c0_6 = arith.constant 0 : index
    %4 = vector.load %arg3[%c0_5, %c0_6] : memref<32x32xf32, #tpu.memory_space<vmem>>, vector<32x32xf32>
    %cst_7 = arith.constant dense<0.000000e+00> : vector<16x32xf32>
    %5 = tpu.matmul %0, %4, %cst_7 {dimension_numbers = #tpu.dot_dimension_numbers<[1], [0], [0], [1], [0, 0, 1, 1], [], []>} : vector<16x32xf32>, vector<32x32xf32>, vector<16x32xf32> -> vector<16x32xf32>
    %c0_8 = arith.constant 0 : index
    %c0_9 = arith.constant 0 : index
    %6 = vector.load %arg6[%c0_8, %c0_9] : memref<16x32xf32, #tpu.memory_space<vmem>>, vector<16x32xf32>
    tpu.vector_store %arg6[%c0_8, %c0_9], %5 {strides = array<i32>} : memref<16x32xf32, #tpu.memory_space<vmem>>, vector<16x32xf32>,
    %c0_10 = arith.constant 0 : index
    %c0_11 = arith.constant 0 : index
    %7 = vector.load %arg4[%c0_10, %c0_11] : memref<32x32xf32, #tpu.memory_space<vmem>>, vector<32x32xf32>
    %cst_12 = arith.constant dense<0.000000e+00> : vector<16x32xf32>
    %8 = tpu.matmul %0, %7, %cst_12 {dimension_numbers = #tpu.dot_dimension_numbers<[1], [0], [0], [1], [0, 0, 1, 1], [], []>} : vector<16x32xf32>, vector<32x32xf32>, vector<16x32xf32> -> vector<16x32xf32>
    %c0_13 = arith.constant 0 : index
    %c0_14 = arith.constant 0 : index
    %9 = vector.load %arg7[%c0_13, %c0_14] : memref<16x32xf32, #tpu.memory_space<vmem>>, vector<16x32xf32>
    tpu.vector_store %arg7[%c0_13, %c0_14], %8 {strides = array<i32>} : memref<16x32xf32, #tpu.memory_space<vmem>>, vector<16x32xf32>,
    return
  }
  func.func @transform_0(%arg0: i32) -> (i32, i32) {
    %c0_i32 = arith.constant 0 : i32
    %c0_i32_0 = arith.constant 0 : i32
    return %arg0, %c0_i32 : i32, i32
  }
  func.func @transform_1(%arg0: i32) -> (i32, i32) {
    %c0_i32 = arith.constant 0 : i32
    %c0_i32_0 = arith.constant 0 : i32
    %c0_i32_1 = arith.constant 0 : i32
    return %c0_i32, %c0_i32_0 : i32, i32
  }
  func.func @transform_2(%arg0: i32) -> (i32, i32) {
    %c0_i32 = arith.constant 0 : i32
    %c0_i32_0 = arith.constant 0 : i32
    %c0_i32_1 = arith.constant 0 : i32
    return %c0_i32, %c0_i32_0 : i32, i32
  }
  func.func @transform_3(%arg0: i32) -> (i32, i32) {
    %c0_i32 = arith.constant 0 : i32
    %c0_i32_0 = arith.constant 0 : i32
    %c0_i32_1 = arith.constant 0 : i32
    return %c0_i32, %c0_i32_0 : i32, i32
  }
  func.func @transform_4(%arg0: i32) -> (i32, i32) {
    %c0_i32 = arith.constant 0 : i32
    %c0_i32_0 = arith.constant 0 : i32
    return %arg0, %c0_i32 : i32, i32
  }
  func.func @transform_5(%arg0: i32) -> (i32, i32) {
    %c0_i32 = arith.constant 0 : i32
    %c0_i32_0 = arith.constant 0 : i32
    return %arg0, %c0_i32 : i32, i32
  }
  func.func @transform_6(%arg0: i32) -> (i32, i32) {
    %c0_i32 = arith.constant 0 : i32
    %c0_i32_0 = arith.constant 0 : i32
    return %arg0, %c0_i32 : i32, i32
  }
}

</mosaic_0001>

<bundles_post_ra>
// kernel: tpu_custom_call.1
= control target key start
LH: loop header
LB: loop body
LE: loop exit
PB: predicated region body
PF: predicated region fallthrough
CT: control target
= control target key end

     0   :  { %12 = vsyncpa [#allocation3], 0  ;;  %s815_s0 = inlined_call_operand.hbm [shape: f32[16,32], index: 0, kind: input, shape index: {}]   ;;  %s816_s1 = inlined_call_operand.hbm [shape: f32[32,32], index: 1, kind: input, shape index: {}]   ;;  %s817_s2 = inlined_call_operand.hbm [shape: f32[32,32], index: 2, kind: input, shape index: {}]   ;;  %s818_s3 = inlined_call_operand.hbm [shape: f32[32,32], index: 3, kind: input, shape index: {}]   ;;  %s819_s4 = inlined_call_operand.hbm [shape: f32[16,32], index: 4, kind: output, shape index: {0}]   ;;  %s820_s5 = inlined_call_operand.hbm [shape: f32[16,32], index: 5, kind: output, shape index: {1}]   ;;  %s821_s6 = inlined_call_operand.hbm [shape: f32[16,32], index: 6, kind: output, shape index: {2}]  }
   0x1   :  { %13 = vsyncpa [#allocation6], 0 }
   0x2   :  { %14 = vsyncpa [#allocation9], 0 }
   0x3   :  { %15 = vsyncpa [#allocation4], 0 }
   0x4   :  { %16 = vsyncpa [#allocation12], 0  ;;  %s633_s21 = smov [#allocation5]   ;;  %s634_s23 = smov [#allocation2]  }
   0x5   :  { %s34_s22 = sshll.u32 %s633_s21, 4  ;;  %s22_s24 = sshll.u32 %s634_s23, 4  ;;  %s35_s22 = int_to_ptr.vmem [resolvable:$true] %s34_s22  ;;  %s677_s24 = int_to_ptr.vmem [resolvable:$true] %s22_s24 }
   0x6   :  { %s469_s27 = scalar_lea.hbm %s816_s1, 512 }
   0x7   :  { %p470_p0 = scmp.ne.s32.totalorder %s816_s1, %s469_s27  ;;  %p473_p1 = scmp.lt.u32.totalorder %s469_s27, %s816_s1 }
   0x9   :  { %p475_p2 = pnand %p473_p1, %p470_p0 }
   0xb   :  { %478 = shalt.err (!%p475_p2)
}
   0xc   :  { %s479_s8 = scalar_lea.vmem %s35_s22, 512  ;;  %p484_p4 = scmp.lt.s32.totalorder %s35_s22, %s35_s22 }
   0xd   :  { %p480_p3 = scmp.ne.s32.totalorder %s35_s22, %s479_s8  ;;  %p485_p5 = scmp.lt.s32.totalorder %s479_s8, %s479_s8 }
   0xf   :  { %p486_p6 = por %p485_p5, %p484_p4 }
  0x11   :  { %p487_p7 = pnand %p486_p6, %p480_p3 }
  0x13   :  { %490 = shalt.err (!%p487_p7)
}
  0x14   :  { %s635_s9 = smov 128   ;;  %s636_s10 = smov 8  }
  0x15   :  { %40 = dma.hbm_to_vmem [thread:$0]  %s816_s1, 512, %s35_s22, [#allocation6], %s635_s9, %s635_s9, %s636_s10  }
  0x16   :  { %s491_s15 = scalar_lea.hbm %s815_s0, 256 }
  0x17   :  { %p492_p8 = scmp.ne.s32.totalorder %s815_s0, %s491_s15  ;;  %p495_p9 = scmp.lt.u32.totalorder %s491_s15, %s815_s0 }
  0x19   :  { %p497_p10 = pnand %p495_p9, %p492_p8 }
  0x1b   :  { %500 = shalt.err (!%p497_p10)
}
  0x1c   :  { %s501_s20 = scalar_lea.vmem %s677_s24, 256  ;;  %p506_p12 = scmp.lt.s32.totalorder %s677_s24, %s677_s24 }
  0x1d   :  { %p502_p11 = scmp.ne.s32.totalorder %s677_s24, %s501_s20  ;;  %p507_p13 = scmp.lt.s32.totalorder %s501_s20, %s501_s20 }
  0x1f   :  { %p508_p0 = por %p507_p13, %p506_p12 }
  0x21   :  { %p509_p1 = pnand %p508_p0, %p502_p11 }
  0x23   :  { %512 = shalt.err (!%p509_p1)
}
  0x24   :  { %28 = dma.hbm_to_vmem [thread:$0]  %s815_s0, 256, %s677_s24, [#allocation3], %s635_s9, %s635_s9, %s636_s10  }
  0x25   :  { %s637_s22 = smov [#allocation7]   ;;  %s638_s25 = smov [#allocation8]  }
  0x26   :  { %s46_s23 = sshll.u32 %s637_s22, 4  ;;  %s58_s26 = sshll.u32 %s638_s25, 4  ;;  %s47_s23 = int_to_ptr.vmem [resolvable:$true] %s46_s23  ;;  %s714_s26 = int_to_ptr.vmem [resolvable:$true] %s58_s26 }
  0x27   :  { %s513_s29 = scalar_lea.hbm %s817_s2, 512 }
  0x28   :  { %p514_p2 = scmp.ne.s32.totalorder %s817_s2, %s513_s29  ;;  %p517_p3 = scmp.lt.u32.totalorder %s513_s29, %s817_s2 }
  0x2a   :  { %p519_p4 = pnand %p517_p3, %p514_p2 }
  0x2c   :  { %522 = shalt.err (!%p519_p4)
}
  0x2d   :  { %s523_s0 = scalar_lea.vmem %s47_s23, 512  ;;  %p528_p6 = scmp.lt.s32.totalorder %s47_s23, %s47_s23 }
  0x2e   :  { %p524_p5 = scmp.ne.s32.totalorder %s47_s23, %s523_s0  ;;  %p529_p7 = scmp.lt.s32.totalorder %s523_s0, %s523_s0 }
  0x30   :  { %p530_p8 = por %p529_p7, %p528_p6 }
  0x32   :  { %p531_p9 = pnand %p530_p8, %p524_p5 }
  0x34   :  { %534 = shalt.err (!%p531_p9)
}
  0x35   :  { %52 = dma.hbm_to_vmem [thread:$0]  %s817_s2, 512, %s47_s23, [#allocation6], %s635_s9, %s635_s9, %s636_s10  }
  0x36   :  { %s535_s15 = scalar_lea.hbm %s818_s3, 512 }
  0x37   :  { %p536_p10 = scmp.ne.s32.totalorder %s818_s3, %s535_s15  ;;  %p539_p11 = scmp.lt.u32.totalorder %s535_s15, %s818_s3 }
  0x39   :  { %p541_p12 = pnand %p539_p11, %p536_p10 }
  0x3b   :  { %544 = shalt.err (!%p541_p12)
}
  0x3c   :  { %s545_s20 = scalar_lea.vmem %s714_s26, 512  ;;  %p550_p0 = scmp.lt.s32.totalorder %s714_s26, %s714_s26 }
  0x3d   :  { %p546_p13 = scmp.ne.s32.totalorder %s714_s26, %s545_s20  ;;  %p551_p1 = scmp.lt.s32.totalorder %s545_s20, %s545_s20 }
  0x3f   :  { %p552_p2 = por %p551_p1, %p550_p0 }
  0x41   :  { %p553_p3 = pnand %p552_p2, %p546_p13 }
  0x43   :  { %556 = shalt.err (!%p553_p3)
}
  0x44   :  { %64 = dma.hbm_to_vmem [thread:$0]  %s818_s3, 512, %s714_s26, [#allocation9], %s635_s9, %s635_s9, %s636_s10  }
  0x45   :  { %623 = dma.done.wait [#allocation3], 256  }
  0x46   :  { %624 = vsyncadd [#allocation3], 4294967040 }
  0x47   :  { %625 = dma.done.wait [#allocation6], 1024  }
  0x48   :  { %626 = vsyncadd [#allocation6], 4294966272 }
  0x49   :  { %627 = dma.done.wait [#allocation9], 512  }
  0x4a   :  { %628 = vsyncadd [#allocation9], 4294966784  ;;  %v79_v0 = vld [vmem:[#allocation5] sm:$0xff]  ;;  %v80_v1 = vld [vmem:[#allocation5 + $0x8] sm:$0xff]  ;;  %vm83_vm0 = vcmask 261120   ;;  %s639_s3 = smov [#allocation10]  }
  0x4b   :  { %v81_v2 = vld [vmem:[#allocation5 + $0x10] sm:$0xff]  ;;  %v436_v3 = vpack.c.bf16 %v80_v1, %v79_v0  ;;  %v82_v4 = vld [vmem:[#allocation5 + $0x18] sm:$0xff]  ;;  %v167_v5 = vld [vmem:[#allocation7] sm:$0xff]  ;;  %s334_s21 = sshll.u32 %s639_s3, 4  ;;  %s640_s22 = smov [#allocation11]   ;;  %s335_s21 = int_to_ptr.vmem [resolvable:$true] %s334_s21 }
  0x4c   :  { %v168_v6 = vld [vmem:[#allocation7 + $0x8] sm:$0xff]  ;;  %v440_v7 = vpack.c.bf16 %v82_v4, %v81_v2  ;;  %v77_v9 = vld [vmem:[#allocation2] sm:$0xff]  ;;  %v248_v10 = vld [vmem:[#allocation8] sm:$0xff]  ;;  %s346_s23 = sshll.u32 %s640_s22, 4  ;;  %s557_s25 = scalar_lea.vmem %s335_s21, 256  ;;  %s758_s23 = int_to_ptr.vmem [resolvable:$true] %s346_s23 }
  0x4d   :  { %v444_v8 = vpack.c.bf16 %v168_v6, %v167_v5  ;;  %437 = vmatprep.subr.bf16.mxu0 %v436_v3  ;;  %411 = vmatprep.mubr.msk.f32.mxu0 %vm83_vm0, %v77_v9  ;;  %v249_v11 = vld [vmem:[#allocation8 + $0x8] sm:$0xff]  ;;  %v169_v12 = vld [vmem:[#allocation7 + $0x10] sm:$0xff]  ;;  %v170_v13 = vld [vmem:[#allocation7 + $0x18] sm:$0xff]  ;;  %p558_p4 = scmp.ne.s32.totalorder %s335_s21, %s557_s25  ;;  %p562_p5 = scmp.lt.s32.totalorder %s335_s21, %s335_s21 }
  0x4e   :  { %439 = vmatpush3.bf16.msra.mxu0 %v436_v3  ;;  %v448_v14 = vpack.c.bf16 %v170_v13, %v169_v12  ;;  %v452_v15 = vpack.c.bf16 %v249_v11, %v248_v10  ;;  %v250_v16 = vld [vmem:[#allocation8 + $0x10] sm:$0xff]  ;;  %v251_v17 = vld [vmem:[#allocation8 + $0x18] sm:$0xff]  ;;  %422 = vmatprep.mubr.msk.f32.mxu1 %vm83_vm0, %v77_v9  ;;  %p563_p6 = scmp.lt.s32.totalorder %s557_s25, %s557_s25 }
  0x4f   :  { %445 = vmatprep.subr.bf16.mxu1 %v444_v8  ;;  %441 = vmatprep.subr.bf16.mxu0 %v440_v7  ;;  %v78_v18 = vld [vmem:[#allocation2 + $0x8] sm:$0xff]  ;;  %v456_v19 = vpack.c.bf16 %v251_v17, %v250_v16 }
  0x50   :  { %447 = vmatpush3.bf16.msra.mxu1 %v444_v8  ;;  %p564_p7 = por %p563_p6, %p562_p5 }
  0x51   :  { %449 = vmatprep.subr.bf16.mxu1 %v448_v14 }
  0x52   :  { %443 = vmatpush3.bf16.msra.mxu0 %v440_v7  ;;  %p565_p8 = pnand %p564_p7, %p558_p4 }
  0x53   :  { %453 = vmatprep.subr.bf16.mxu0 %v452_v15 }
  0x54   :  { %451 = vmatpush3.bf16.msra.mxu1 %v448_v14 }
  0x55   :  { %412 = vmatmul.mubr.msk.f32.vlgmr.msra.gmra.mrb[0].mxu0 %vm83_vm0, %v78_v18 }
  0x56   :  { %455 = vmatpush3.bf16.msra.mxu0 %v452_v15  ;;  %433 = vmatprep.mubr.msk.f32.mxu0 %vm83_vm0, %v77_v9 }
  0x57   :  { %423 = vmatmul.mubr.msk.f32.vlgmr.msra.gmra.mrb[0].mxu1 %vm83_vm0, %v78_v18  ;;  %457 = vmatprep.subr.bf16.mxu0 %v456_v19 }
  0x5a   :  { %459 = vmatpush3.bf16.msra.mxu0 %v456_v19 }
  0x5d   :  { %434 = vmatmul.mubr.msk.f32.vlgmr.msra.gmra.mrb[2].mxu0 %vm83_vm0, %v78_v18 }
 0x128   :  { %v413_v20 = vpop.f32.mrb[0].mxu0 }
 0x129   :  { %166 = vst.msk [vmem:[#allocation10 + $0x8] sm:$0xff] %vm83_vm0, %v413_v20  ;;  %v156_v21 = vpop.f32.mrb[1].mxu0 }
 0x12a   :  { %v424_v22 = vpop.f32.mrb[0].mxu1  ;;  %165 = vst.msk [vmem:[#allocation10] sm:$0xff] %vm83_vm0, %v156_v21 }
 0x12b   :  { %247 = vst.msk [vmem:[#allocation11 + $0x8] sm:$0xff] %vm83_vm0, %v424_v22  ;;  %v237_v23 = vpop.f32.mrb[1].mxu1 }
 0x12c   :  { %246 = vst.msk [vmem:[#allocation11] sm:$0xff] %vm83_vm0, %v237_v23 }
 0x12d   :  { %568 = shalt.err (!%p565_p8)
}
 0x12e   :  { %s569_s28 = scalar_lea.hbm %s819_s4, 256 }
 0x12f   :  { %p570_p9 = scmp.ne.s32.totalorder %s819_s4, %s569_s28  ;;  %p573_p10 = scmp.lt.u32.totalorder %s569_s28, %s819_s4 }
 0x131   :  { %p575_p11 = pnand %p573_p10, %p570_p9 }
 0x133   :  { %578 = shalt.err (!%p575_p11)
}
 0x134   :  { %340 = dma.vmem_to_hbm [thread:$0]  %s335_s21, 256, %s819_s4, [#allocation4], %s635_s9, %s635_s9, %s636_s10  }
 0x135   :  { %s579_s24 = scalar_lea.vmem %s758_s23, 256  ;;  %p584_p13 = scmp.lt.s32.totalorder %s758_s23, %s758_s23 }
 0x136   :  { %p580_p12 = scmp.ne.s32.totalorder %s758_s23, %s579_s24  ;;  %p585_p0 = scmp.lt.s32.totalorder %s579_s24, %s579_s24 }
 0x138   :  { %p586_p1 = por %p585_p0, %p584_p13 }
 0x13a   :  { %p587_p2 = pnand %p586_p1, %p580_p12 }
 0x13c   :  { %590 = shalt.err (!%p587_p2)
}
 0x13d   :  { %s591_s14 = scalar_lea.hbm %s820_s5, 256 }
 0x13e   :  { %p592_p3 = scmp.ne.s32.totalorder %s820_s5, %s591_s14  ;;  %p595_p4 = scmp.lt.u32.totalorder %s591_s14, %s820_s5 }
 0x140   :  { %p597_p5 = pnand %p595_p4, %p592_p3 }
 0x142   :  { %600 = shalt.err (!%p597_p5)
}
 0x143   :  { %352 = dma.vmem_to_hbm [thread:$0]  %s758_s23, 256, %s820_s5, [#allocation12], %s635_s9, %s635_s9, %s636_s10   ;;  %v435_v24 = vpop.f32.mrb[2].mxu0 }
 0x144   :  { %s641_s20 = smov [#allocation13]   ;;  %328 = vst.msk [vmem:[#allocation13 + $0x8] sm:$0xff] %vm83_vm0, %v435_v24  ;;  %v318_v25 = vpop.f32.mrb[3].mxu0 }
 0x145   :  { %s358_s2 = sshll.u32 %s641_s20, 4  ;;  %327 = vst.msk [vmem:[#allocation13] sm:$0xff] %vm83_vm0, %v318_v25  ;;  %s359_s2 = int_to_ptr.vmem [resolvable:$true] %s358_s2 }
 0x146   :  { %s601_s1 = scalar_lea.vmem %s359_s2, 256  ;;  %p606_p7 = scmp.lt.s32.totalorder %s359_s2, %s359_s2 }
 0x147   :  { %p602_p6 = scmp.ne.s32.totalorder %s359_s2, %s601_s1  ;;  %p607_p8 = scmp.lt.s32.totalorder %s601_s1, %s601_s1 }
 0x149   :  { %p608_p9 = por %p607_p8, %p606_p7 }
 0x14b   :  { %p609_p10 = pnand %p608_p9, %p602_p6 }
 0x14d   :  { %612 = shalt.err (!%p609_p10)
}
 0x14e   :  { %s613_s5 = scalar_lea.hbm %s821_s6, 256 }
 0x14f   :  { %p614_p11 = scmp.ne.s32.totalorder %s821_s6, %s613_s5  ;;  %p617_p12 = scmp.lt.u32.totalorder %s613_s5, %s821_s6 }
 0x151   :  { %p619_p13 = pnand %p617_p12, %p614_p11 }
 0x153   :  { %622 = shalt.err (!%p619_p13)
}
 0x154   :  { %364 = dma.vmem_to_hbm [thread:$0]  %s359_s2, 256, %s821_s6, [#allocation12], %s635_s9, %s635_s9, %s636_s10  }
 0x155   :  { %629 = dma.done.wait [#allocation4], 256  }
 0x156   :  { %630 = vsyncadd [#allocation4], 4294967040 }
 0x157   :  { %631 = dma.done.wait [#allocation12], 512  }
 0x158   :  { %632 = vsyncadd [#allocation12], 4294966784 }
 0x159   :  { %374 = vsyncpa [#allocation3], 1 }
 0x15a   :  { %375 = vsyncpa [#allocation6], 1 }
 0x15b   :  { %376 = vsyncpa [#allocation9], 1 }
 0x15c   :  { %377 = vsyncpa [#allocation4], 1 }
 0x15d   :  { %378 = vsyncpa [#allocation12], 1 }

</bundles_post_ra>
